<compile_context>
chip_gen: v7x
topology: tpu7x:2x2x1
jax: 0.10.0
libtpu: 0.0.40
codegen_flags: <defaults>
</compile_context>

<pallas_src>
import functools
import math

import jax
import jax.numpy as jnp
from jax.experimental import pallas as pl
from jax.experimental.pallas import tpu as pltpu


# ----------------------------------------------------------------------------
# Kernel: one affine coupling layer on a (D, TB) lane-major batch tile.
# ----------------------------------------------------------------------------
def _coupling_kernel(x_ref, mask_ref, w1_ref, b1_ref, w2_ref, b2_ref,
                     w3_ref, b3_ref, out_ref, *, reverse: bool, dim: int):
    x = x_ref[...]                      # (D, TB)   batch on lanes
    m = mask_ref[...]                   # (D, 1)    broadcasts over lanes
    inv_m = 1.0 - m

    xm = x * m

    # Fused scale/translate MLPs: 3 matmuls total, hidden layout (2H, TB).
    h = jnp.dot(w1_ref[...], xm, preferred_element_type=jnp.float32) + b1_ref[...]
    h = jnp.maximum(h, 0.0)
    h = jnp.dot(w2_ref[...], h, preferred_element_type=jnp.float32) + b2_ref[...]
    h = jnp.maximum(h, 0.0)
    st = jnp.dot(w3_ref[...], h, preferred_element_type=jnp.float32) + b3_ref[...]

    s = st[:dim, :]                     # (D, TB)  (D multiple of 8 -> aligned)
    t = st[dim:, :]                     # (D, TB)

    if reverse:
        out = xm + inv_m * (x - t) * jnp.exp(-s)
    else:
        out = xm + inv_m * (x * jnp.exp(s) + t)

    out_ref[...] = out.astype(out_ref.dtype)


# ----------------------------------------------------------------------------
# pallas_call wrapper (lane-major activations)
# ----------------------------------------------------------------------------
def _coupling_apply_t(xT, mask_col, fused, *, reverse: bool, block_tb: int):
    """Apply one coupling layer to lane-major activations xT of shape (D, Bp)."""
    D, Bp = xT.shape
    assert Bp % block_tb == 0
    grid = (Bp // block_tb,)

    def resident(a):  # full-array block, constant index map -> stays in VMEM
        return pl.BlockSpec(a.shape, lambda i: (0,) * a.ndim)

    args = (xT, mask_col, fused["w1"], fused["b1"], fused["w2"], fused["b2"],
            fused["w3"], fused["b3"])
    in_specs = [pl.BlockSpec((D, block_tb), lambda i: (0, i))]
    in_specs += [resident(a) for a in args[1:]]

    return pl.pallas_call(
        functools.partial(_coupling_kernel, reverse=reverse, dim=D),
        out_shape=jax.ShapeDtypeStruct((D, Bp), xT.dtype),
        grid=grid,
        in_specs=in_specs,
        out_specs=pl.BlockSpec((D, block_tb), lambda i: (0, i)),
        compiler_params=pltpu.CompilerParams(
            dimension_semantics=("parallel",),
            # Above the 16/32 MiB scoped defaults (v5e/v6e) so large batch
            # tiles still double-buffer, yet under v7x's 64 MiB physical VMEM.
            vmem_limit_bytes=48 * 1024 * 1024,
        ),
    )(*args)


# ----------------------------------------------------------------------------
# Layout helpers (transpose once per flow, stay lane-major across all layers)
# ----------------------------------------------------------------------------
def _round_up(n, m):
    return ((n + m - 1) // m) * m


def _pick_batch_tile(batch, block_b):
    # Lane tile: a multiple of 128 (dense vst), capped at block_b.
    return min(block_b, _round_up(batch, 128))


def _to_lane_major(x, tb):
    """(B, D) -> (D, Bp) with batch zero-padded to a multiple of the lane tile."""
    B, _ = x.shape
    Bp = _round_up(B, tb)
    xT = jnp.transpose(x)
    if Bp != B:
        xT = jnp.pad(xT, ((0, 0), (0, Bp - B)))
    return xT


def _from_lane_major(xT, batch):
    return jnp.transpose(xT)[:batch]


def realnvp_forward(x, layers, *, block_b=1024):
    """layers: list of (mask_col (D,1) f32, fused-params dict)."""
    B, _ = x.shape
    tb = _pick_batch_tile(B, block_b)
    xT = _to_lane_major(x, tb)
    for mask_col, fused in layers:
        xT = _coupling_apply_t(xT, mask_col, fused, reverse=False, block_tb=tb)
    return _from_lane_major(xT, B)


def realnvp_inverse(z, layers, *, block_b=1024):
    B, _ = z.shape
    tb = _pick_batch_tile(B, block_b)
    zT = _to_lane_major(z, tb)
    for mask_col, fused in reversed(layers):
        zT = _coupling_apply_t(zT, mask_col, fused, reverse=True, block_tb=tb)
    return _from_lane_major(zT, B)


# ----------------------------------------------------------------------------
# Parameters (PyTorch-style init) + one-time fusion
# ----------------------------------------------------------------------------
def make_mask(dim, even):
    idx = jnp.arange(dim)
    return jnp.where((idx % 2 == 0) == even, 1.0, 0.0).astype(jnp.float32)


def init_coupling_params(key, dim, hidden):
    """nn.Linear-style init; weights stored (out, in) like PyTorch."""
    ks = jax.random.split(key, 12)

    def lin(kw, kb, fan_in, fan_out):
        bound = 1.0 / math.sqrt(fan_in)
        w = jax.random.uniform(kw, (fan_out, fan_in), jnp.float32, -bound, bound)
        b = jax.random.uniform(kb, (fan_out,), jnp.float32, -bound, bound)
        return w, b

    sw1, sb1 = lin(ks[0], ks[1], dim, hidden)
    sw2, sb2 = lin(ks[2], ks[3], hidden, hidden)
    sw3, sb3 = lin(ks[4], ks[5], hidden, dim)
    tw1, tb1 = lin(ks[6], ks[7], dim, hidden)
    tw2, tb2 = lin(ks[8], ks[9], hidden, hidden)
    tw3, tb3 = lin(ks[10], ks[11], hidden, dim)
    return dict(sw1=sw1, sb1=sb1, sw2=sw2, sb2=sb2, sw3=sw3, sb3=sb3,
                tw1=tw1, tb1=tb1, tw2=tw2, tb2=tb2, tw3=tw3, tb3=tb3)


def _block_diag(a, b):
    za = jnp.zeros((a.shape[0], b.shape[1]), a.dtype)
    zb = jnp.zeros((b.shape[0], a.shape[1]), b.dtype)
    return jnp.concatenate(
        [jnp.concatenate([a, za], axis=1), jnp.concatenate([zb, b], axis=1)],
        axis=0)


def fuse_coupling_params(p):
    """One-time fusion of the scale/translate MLPs into 3 matmul operands."""
    return dict(
        w1=jnp.concatenate([p["sw1"], p["tw1"]], axis=0),            # (2H, D)
        b1=jnp.concatenate([p["sb1"], p["tb1"]], axis=0)[:, None],   # (2H, 1)
        w2=_block_diag(p["sw2"], p["tw2"]),                          # (2H, 2H)
        b2=jnp.concatenate([p["sb2"], p["tb2"]], axis=0)[:, None],   # (2H, 1)
        w3=_block_diag(p["sw3"], p["tw3"]),                          # (2D, 2H)
        b3=jnp.concatenate([p["sb3"], p["tb3"]], axis=0)[:, None],   # (2D, 1)
    )


# ----------------------------------------------------------------------------
# Pure-JAX reference mirroring the PyTorch module
# ----------------------------------------------------------------------------
def coupling_reference(x, mask, p, *, reverse=False):
    m = mask.reshape(1, -1)
    xm = x * m

    def mlp(z, pre):
        h = jnp.maximum(z @ p[pre + "w1"].T + p[pre + "b1"], 0.0)
        h = jnp.maximum(h @ p[pre + "w2"].T + p[pre + "b2"], 0.0)
        return h @ p[pre + "w3"].T + p[pre + "b3"]

    s = mlp(xm, "s") * (1.0 - m)
    t = mlp(xm, "t") * (1.0 - m)
    if reverse:
        return xm + (1.0 - m) * (x - t) * jnp.exp(-s)
    return xm + (1.0 - m) * (x * jnp.exp(s) + t)


def realnvp_reference_forward(x, masks, raw_params):
    out = x
    for mask, p in zip(masks, raw_params):
        out = coupling_reference(out, mask, p, reverse=False)
    return out


def realnvp_reference_inverse(z, masks, raw_params):
    out = z
    for mask, p in zip(reversed(masks), reversed(raw_params)):
        out = coupling_reference(out, mask, p, reverse=True)
    return out


if __name__ == "__main__":
    batch, dim, hidden, n_flows = 8, 16, 32, 2

    key = jax.random.PRNGKey(0)
    k_x, k_p = jax.random.split(key)
    x = jax.random.normal(k_x, (batch, dim), jnp.float32)

    layer_keys = jax.random.split(k_p, n_flows)
    masks = [make_mask(dim, even=(i % 2 == 0)) for i in range(n_flows)]
    raw = [init_coupling_params(layer_keys[i], dim, hidden) for i in range(n_flows)]
    # Mask column + fused weights prepared once, outside the per-call path.
    layers = [(m.reshape(dim, 1), fuse_coupling_params(p)) for m, p in zip(masks, raw)]

    out_fwd = realnvp_forward(x, layers)
    out_inv = realnvp_inverse(x, layers)
    jax.block_until_ready((out_fwd, out_inv))

    ref_fwd = realnvp_reference_forward(x, masks, raw)
    ref_inv = realnvp_reference_inverse(x, masks, raw)

    assert jnp.allclose(out_fwd, ref_fwd, atol=1e-4, rtol=1e-4), \
        float(jnp.max(jnp.abs(out_fwd - ref_fwd)))
    assert jnp.allclose(out_inv, ref_inv, atol=1e-4, rtol=1e-4), \
        float(jnp.max(jnp.abs(out_inv - ref_inv)))

    # Bijectivity sanity check: inverse(forward(x)) ~= x.
    roundtrip = realnvp_inverse(out_fwd, layers)
    assert jnp.allclose(roundtrip, x, atol=1e-3, rtol=1e-3)

    print("KERNEL_OK")
</pallas_src>

<mosaic_0001>
module attributes {stable_mosaic.version = 11 : i64} {
  func.func @_coupling_kernel(%arg0: i32, %arg1: memref<16x128xf32, #tpu.memory_space<vmem>>, %arg2: memref<16x1xf32, #tpu.memory_space<vmem>>, %arg3: memref<64x16xf32, #tpu.memory_space<vmem>>, %arg4: memref<64x1xf32, #tpu.memory_space<vmem>>, %arg5: memref<64x64xf32, #tpu.memory_space<vmem>>, %arg6: memref<64x1xf32, #tpu.memory_space<vmem>>, %arg7: memref<32x64xf32, #tpu.memory_space<vmem>>, %arg8: memref<32x1xf32, #tpu.memory_space<vmem>>, %arg9: memref<16x128xf32, #tpu.memory_space<vmem>>) attributes {dimension_semantics = [#tpu.dimension_semantics<parallel>], iteration_bounds = array<i64: 1>, scalar_prefetch = 0 : i64, scratch_operands = 0 : i64, tpu.core_type = #tpu.core_type<tc>, window_params = [{transform_indices = @transform_0, window_bounds = array<i64: 16, 128>}, {pipeline_mode = #tpu.pipeline_mode<synchronous>, transform_indices = @transform_1, window_bounds = array<i64: 16, 1>}, {pipeline_mode = #tpu.pipeline_mode<synchronous>, transform_indices = @transform_2, window_bounds = array<i64: 64, 16>}, {pipeline_mode = #tpu.pipeline_mode<synchronous>, transform_indices = @transform_3, window_bounds = array<i64: 64, 1>}, {pipeline_mode = #tpu.pipeline_mode<synchronous>, transform_indices = @transform_4, window_bounds = array<i64: 64, 64>}, {pipeline_mode = #tpu.pipeline_mode<synchronous>, transform_indices = @transform_5, window_bounds = array<i64: 64, 1>}, {pipeline_mode = #tpu.pipeline_mode<synchronous>, transform_indices = @transform_6, window_bounds = array<i64: 32, 64>}, {pipeline_mode = #tpu.pipeline_mode<synchronous>, transform_indices = @transform_7, window_bounds = array<i64: 32, 1>}, {transform_indices = @transform_8, window_bounds = array<i64: 16, 128>}]} {
    %c0 = arith.constant 0 : index
    %c0_0 = arith.constant 0 : index
    %0 = vector.load %arg1[%c0, %c0_0] : memref<16x128xf32, #tpu.memory_space<vmem>>, vector<16x128xf32>
    %c0_1 = arith.constant 0 : index
    %c0_2 = arith.constant 0 : index
    %1 = vector.load %arg2[%c0_1, %c0_2] : memref<16x1xf32, #tpu.memory_space<vmem>>, vector<16x1xf32>
    %cst = arith.constant 1.000000e+00 : f32
    %2 = vector.broadcast %cst : f32 to vector<16x1xf32>
    %3 = arith.subf %2, %1 : vector<16x1xf32>
    %4 = vector.broadcast %1 : vector<16x1xf32> to vector<16x128xf32>
    %5 = arith.mulf %0, %4 : vector<16x128xf32>
    %c0_3 = arith.constant 0 : index
    %c0_4 = arith.constant 0 : index
    %6 = vector.load %arg3[%c0_3, %c0_4] : memref<64x16xf32, #tpu.memory_space<vmem>>, vector<64x16xf32>
    %cst_5 = arith.constant dense<0.000000e+00> : vector<64x128xf32>
    %7 = tpu.matmul %6, %5, %cst_5 {dimension_numbers = #tpu.dot_dimension_numbers<[1], [0], [0], [1], [0, 0, 1, 1], [], []>} : vector<64x16xf32>, vector<16x128xf32>, vector<64x128xf32> -> vector<64x128xf32>
    %c0_6 = arith.constant 0 : index
    %c0_7 = arith.constant 0 : index
    %8 = vector.load %arg4[%c0_6, %c0_7] : memref<64x1xf32, #tpu.memory_space<vmem>>, vector<64x1xf32>
    %9 = vector.broadcast %8 : vector<64x1xf32> to vector<64x128xf32>
    %10 = arith.addf %7, %9 : vector<64x128xf32>
    %cst_8 = arith.constant 0.000000e+00 : f32
    %11 = vector.broadcast %cst_8 : f32 to vector<64x128xf32>
    %12 = arith.maximumf %10, %11 : vector<64x128xf32>
    %c0_9 = arith.constant 0 : index
    %c0_10 = arith.constant 0 : index
    %13 = vector.load %arg5[%c0_9, %c0_10] : memref<64x64xf32, #tpu.memory_space<vmem>>, vector<64x64xf32>
    %cst_11 = arith.constant dense<0.000000e+00> : vector<64x128xf32>
    %14 = tpu.matmul %13, %12, %cst_11 {dimension_numbers = #tpu.dot_dimension_numbers<[1], [0], [0], [1], [0, 0, 1, 1], [], []>} : vector<64x64xf32>, vector<64x128xf32>, vector<64x128xf32> -> vector<64x128xf32>
    %c0_12 = arith.constant 0 : index
    %c0_13 = arith.constant 0 : index
    %15 = vector.load %arg6[%c0_12, %c0_13] : memref<64x1xf32, #tpu.memory_space<vmem>>, vector<64x1xf32>
    %16 = vector.broadcast %15 : vector<64x1xf32> to vector<64x128xf32>
    %17 = arith.addf %14, %16 : vector<64x128xf32>
    %cst_14 = arith.constant 0.000000e+00 : f32
    %18 = vector.broadcast %cst_14 : f32 to vector<64x128xf32>
    %19 = arith.maximumf %17, %18 : vector<64x128xf32>
    %c0_15 = arith.constant 0 : index
    %c0_16 = arith.constant 0 : index
    %20 = vector.load %arg7[%c0_15, %c0_16] : memref<32x64xf32, #tpu.memory_space<vmem>>, vector<32x64xf32>
    %cst_17 = arith.constant dense<0.000000e+00> : vector<32x128xf32>
    %21 = tpu.matmul %20, %19, %cst_17 {dimension_numbers = #tpu.dot_dimension_numbers<[1], [0], [0], [1], [0, 0, 1, 1], [], []>} : vector<32x64xf32>, vector<64x128xf32>, vector<32x128xf32> -> vector<32x128xf32>
    %c0_18 = arith.constant 0 : index
    %c0_19 = arith.constant 0 : index
    %22 = vector.load %arg8[%c0_18, %c0_19] : memref<32x1xf32, #tpu.memory_space<vmem>>, vector<32x1xf32>
    %23 = vector.broadcast %22 : vector<32x1xf32> to vector<32x128xf32>
    %24 = arith.addf %21, %23 : vector<32x128xf32>
    %25 = vector.extract_strided_slice %24 {offsets = [0, 0], sizes = [16, 128], strides = [1, 1]} : vector<32x128xf32> to vector<16x128xf32>
    %26 = vector.extract_strided_slice %24 {offsets = [16, 0], sizes = [16, 128], strides = [1, 1]} : vector<32x128xf32> to vector<16x128xf32>
    %27 = math.exp %25 : vector<16x128xf32>
    %28 = arith.mulf %0, %27 : vector<16x128xf32>
    %29 = arith.addf %28, %26 : vector<16x128xf32>
    %30 = vector.broadcast %3 : vector<16x1xf32> to vector<16x128xf32>
    %31 = arith.mulf %30, %29 : vector<16x128xf32>
    %32 = arith.addf %5, %31 : vector<16x128xf32>
    %c0_20 = arith.constant 0 : index
    %c0_21 = arith.constant 0 : index
    %33 = vector.load %arg9[%c0_20, %c0_21] : memref<16x128xf32, #tpu.memory_space<vmem>>, vector<16x128xf32>
    tpu.vector_store %arg9[%c0_20, %c0_21], %32 {strides = array<i32>} : memref<16x128xf32, #tpu.memory_space<vmem>>, vector<16x128xf32>,
    return
  }
  func.func @transform_0(%arg0: i32) -> (i32, i32) {
    %c0_i32 = arith.constant 0 : i32
    %c0_i32_0 = arith.constant 0 : i32
    return %c0_i32, %arg0 : i32, i32
  }
  func.func @transform_1(%arg0: i32) -> (i32, i32) {
    %c0_i32 = arith.constant 0 : i32
    %c0_i32_0 = arith.constant 0 : i32
    %c0_i32_1 = arith.constant 0 : i32
    return %c0_i32, %c0_i32_0 : i32, i32
  }
  func.func @transform_2(%arg0: i32) -> (i32, i32) {
    %c0_i32 = arith.constant 0 : i32
    %c0_i32_0 = arith.constant 0 : i32
    %c0_i32_1 = arith.constant 0 : i32
    return %c0_i32, %c0_i32_0 : i32, i32
  }
  func.func @transform_3(%arg0: i32) -> (i32, i32) {
    %c0_i32 = arith.constant 0 : i32
    %c0_i32_0 = arith.constant 0 : i32
    %c0_i32_1 = arith.constant 0 : i32
    return %c0_i32, %c0_i32_0 : i32, i32
  }
  func.func @transform_4(%arg0: i32) -> (i32, i32) {
    %c0_i32 = arith.constant 0 : i32
    %c0_i32_0 = arith.constant 0 : i32
    %c0_i32_1 = arith.constant 0 : i32
    return %c0_i32, %c0_i32_0 : i32, i32
  }
  func.func @transform_5(%arg0: i32) -> (i32, i32) {
    %c0_i32 = arith.constant 0 : i32
    %c0_i32_0 = arith.constant 0 : i32
    %c0_i32_1 = arith.constant 0 : i32
    return %c0_i32, %c0_i32_0 : i32, i32
  }
  func.func @transform_6(%arg0: i32) -> (i32, i32) {
    %c0_i32 = arith.constant 0 : i32
    %c0_i32_0 = arith.constant 0 : i32
    %c0_i32_1 = arith.constant 0 : i32
    return %c0_i32, %c0_i32_0 : i32, i32
  }
  func.func @transform_7(%arg0: i32) -> (i32, i32) {
    %c0_i32 = arith.constant 0 : i32
    %c0_i32_0 = arith.constant 0 : i32
    %c0_i32_1 = arith.constant 0 : i32
    return %c0_i32, %c0_i32_0 : i32, i32
  }
  func.func @transform_8(%arg0: i32) -> (i32, i32) {
    %c0_i32 = arith.constant 0 : i32
    %c0_i32_0 = arith.constant 0 : i32
    return %c0_i32, %arg0 : i32, i32
  }
}

</mosaic_0001>

<bundles_post_ra>
// kernel: tpu_custom_call.1
= control target key start
LH: loop header
LB: loop body
LE: loop exit
PB: predicated region body
PF: predicated region fallthrough
CT: control target
= control target key end

     0   :  { %v795_v1 = vmov 0   ;;  %s1024_s0 = inlined_call_operand.vmem [shape: f32[16,128], index: 0, kind: input, shape index: {}]   ;;  %s1025_s1 = inlined_call_operand.vmem [shape: f32[16,1], index: 1, kind: input, shape index: {}]   ;;  %s1026_s2 = inlined_call_operand.vmem [shape: f32[64,16], index: 2, kind: input, shape index: {}]   ;;  %s1027_s3 = inlined_call_operand.vmem [shape: f32[64,1], index: 3, kind: input, shape index: {}]   ;;  %s1028_s4 = inlined_call_operand.vmem [shape: f32[64,64], index: 4, kind: input, shape index: {}]   ;;  %s1029_s5 = inlined_call_operand.vmem [shape: f32[64,1], index: 5, kind: input, shape index: {}]   ;;  %s1030_s6 = inlined_call_operand.vmem [shape: f32[32,64], index: 6, kind: input, shape index: {}]   ;;  %s1031_s7 = inlined_call_operand.vmem [shape: f32[32,1], index: 7, kind: input, shape index: {}]   ;;  %s1032_s8 = inlined_call_operand.hbm [shape: f32[16,128], index: 8, kind: output, shape index: {}]  }
   0x1   :  { %v32_v0 = vld [vmem:[%s1025_s1] sm:$0xff]  ;;  %765 = vset.pattern.permute.xlu0 %v795_v1  ;;  %766 = vset.pattern.permute.xlu1 %v795_v1  ;;  %v33_v2 = vld [vmem:[%s1025_s1 + $0x8] sm:$0xff] }
   0x2   :  { %38 = vperm.xlu0 %765, %v32_v0  }
   0x3   :  { %13 = vsyncpa [#allocation3], 0  ;;  %v58_v3 = vld [vmem:[%s1027_s3 + $0x10] sm:$0xff]  ;;  %v60_v4 = vld [vmem:[%s1027_s3 + $0x20] sm:$0xff]  ;;  %vm104_vm0 = vcmask 130048   ;;  %v34_v13 = vsub.f32 1.0, %v32_v0 }
   0x4   :  { %v48_v5 = vld [vmem:[%s1026_s2] sm:$0xff]  ;;  %v62_v6 = vld [vmem:[%s1027_s3 + $0x30] sm:$0xff]  ;;  %v57_v15 = vld [vmem:[%s1027_s3 + $0x8] sm:$0xff]  ;;  %v35_v25 = vsub.f32 1.0, %v33_v2  ;;  %vm298_vm1 = vcmask 523264  }
   0x5   :  { %663 = vmatprep.mubr.msk.f32.mxu0 %vm104_vm0, %v48_v5  ;;  %v250_v7 = vld [vmem:[%s1029_s5] sm:$0xff]  ;;  %v252_v8 = vld [vmem:[%s1029_s5 + $0x10] sm:$0xff]  ;;  %v59_v16 = vld [vmem:[%s1027_s3 + $0x18] sm:$0xff] }
   0x6   :  { %43 = vperm.xlu0 %765, %v33_v2   ;;  %v254_v9 = vld [vmem:[%s1029_s5 + $0x20] sm:$0xff]  ;;  %v256_v10 = vld [vmem:[%s1029_s5 + $0x30] sm:$0xff]  ;;  %v61_v17 = vld [vmem:[%s1027_s3 + $0x28] sm:$0xff] }
   0x7   :  { %v440_v11 = vld [vmem:[%s1031_s7] sm:$0xff]  ;;  %v442_v12 = vld [vmem:[%s1031_s7 + $0x10] sm:$0xff]  ;;  %v63_v18 = vld [vmem:[%s1027_s3 + $0x38] sm:$0xff] }
   0x8   :  { %v56_v14 = vld [vmem:[%s1027_s3] sm:$0xff]  ;;  %v251_v19 = vld [vmem:[%s1029_s5 + $0x8] sm:$0xff]  ;;  %v253_v20 = vld [vmem:[%s1029_s5 + $0x18] sm:$0xff] }
   0x9   :  { %66 = vperm.xlu1 %766, %v56_v14   ;;  %v255_v21 = vld [vmem:[%s1029_s5 + $0x28] sm:$0xff]  ;;  %v257_v22 = vld [vmem:[%s1029_s5 + $0x38] sm:$0xff]  ;;  %v917_v27 = vld [vmem:[%s1024_s0] sm:$0xff] }
   0xa   :  { %76 = vperm.xlu0 %765, %v58_v3   ;;  %v441_v23 = vld [vmem:[%s1031_s7 + $0x8] sm:$0xff]  ;;  %v443_v24 = vld [vmem:[%s1031_s7 + $0x18] sm:$0xff]  ;;  %v50_v34 = vld [vmem:[%s1026_s2 + $0x10] sm:$0xff] }
   0xb   :  { %v922_v28 = vld [vmem:[%s1024_s0 + $0x8] sm:$0xff]  ;;  %v51_v35 = vld [vmem:[%s1026_s2 + $0x18] sm:$0xff]  ;;  %v52_v36 = vld [vmem:[%s1026_s2 + $0x20] sm:$0xff] }
   0xc   :  { %v49_v33 = vld [vmem:[%s1026_s2 + $0x8] sm:$0xff]  ;;  %v54_v38 = vld [vmem:[%s1026_s2 + $0x30] sm:$0xff]  ;;  %v55_v39 = vld [vmem:[%s1026_s2 + $0x38] sm:$0xff] }
   0xd   :  { %71 = vperm.xlu1 %766, %v57_v15   ;;  %v53_v37 = vld [vmem:[%s1026_s2 + $0x28] sm:$0xff]  ;;  %v242_v40 = vld [vmem:[%s1028_s4] sm:$0xff]  ;;  %v244_v14 = vld [vmem:[%s1028_s4 + $0x10] sm:$0xff] }
   0xe   :  { %86 = vperm.xlu0 %765, %v60_v4   ;;  %691 = vmatprep.mubr.msk.f32.mxu1 %vm298_vm1, %v242_v40  ;;  %v245_v15 = vld [vmem:[%s1028_s4 + $0x18] sm:$0xff] }
  0x11   :  { %81 = vperm.xlu1 %766, %v59_v16   ;;  %v246_v16 = vld [vmem:[%s1028_s4 + $0x20] sm:$0xff] }
  0x12   :  { %96 = vperm.xlu0 %765, %v62_v6  }
  0x15   :  { %91 = vperm.xlu1 %766, %v61_v17   ;;  %v247_v17 = vld [vmem:[%s1028_s4 + $0x28] sm:$0xff] }
  0x16   :  { %260 = vperm.xlu0 %765, %v250_v7  }
  0x19   :  { %101 = vperm.xlu1 %766, %v63_v18   ;;  %v248_v18 = vld [vmem:[%s1028_s4 + $0x30] sm:$0xff] }
  0x1a   :  { %270 = vperm.xlu0 %765, %v252_v8  }
  0x1d   :  { %265 = vperm.xlu1 %766, %v251_v19   ;;  %v249_v19 = vld [vmem:[%s1028_s4 + $0x38] sm:$0xff] }
  0x1e   :  { %280 = vperm.xlu0 %765, %v254_v9  }
  0x21   :  { %275 = vperm.xlu1 %766, %v253_v20   ;;  %v436_v20 = vld [vmem:[%s1030_s6] sm:$0xff] }
  0x22   :  { %290 = vperm.xlu0 %765, %v256_v10  }
  0x25   :  { %285 = vperm.xlu1 %766, %v255_v21  }
  0x26   :  { %446 = vperm.xlu0 %765, %v440_v11  }
  0x29   :  { %295 = vperm.xlu1 %766, %v257_v22  }
  0x2a   :  { %456 = vperm.xlu0 %765, %v442_v12  }
  0x2d   :  { %451 = vperm.xlu1 %766, %v441_v23  }
  0x2e   :  { %571 = vperm.xlu0 %765, %v34_v13   ;;  %v243_v13 = vld [vmem:[%s1028_s4 + $0x8] sm:$0xff] }
  0x31   :  { %461 = vperm.xlu1 %766, %v443_v24  }
  0x35   :  { %576 = vperm.xlu1 %766, %v35_v25  }
  0x81   :  { %v39_v26 = vpop.permute.xlu0 %38 }
  0x82   :  { %v925_v30 = vmul.f32 %v39_v26, %v917_v27 }
  0x85   :  { %v44_v29 = vpop.permute.xlu0 %43 }
  0x86   :  { %v928_v31 = vmul.f32 %v44_v29, %v922_v28 }
  0x88   :  { %v725_v32 = vpack.c.bf16 %v928_v31, %v925_v30  ;;  %v67_v41 = vpop.permute.xlu1 %66 }
  0x89   :  { %v77_v45 = vpop.permute.xlu0 %76 }
  0x8a   :  { %726 = vmatprep.subr.bf16.mxu0 %v725_v32 }
  0x8b   :  { %728 = vmatpush3.bf16.msra.mxu0 %v725_v32 }
  0x8c   :  { %v72_v42 = vpop.permute.xlu1 %71 }
  0x8d   :  { %v87_v57 = vpop.permute.xlu0 %86 }
  0x8e   :  { %664 = vmatmul.mubr.msk.f32.vlgmr.msra.gmra.mrb[0].mxu0 %vm104_vm0, %v49_v33 }
  0x8f   :  { %666 = vmatprep.mubr.msk.f32.mxu0 %vm104_vm0, %v50_v34 }
  0x90   :  { %v82_v43 = vpop.permute.xlu1 %81 }
  0x91   :  { %v97_v5 = vpop.permute.xlu0 %96 }
  0x92   :  { %667 = vmatmul.mubr.msk.f32.gmra.mrb[2].mxu0 %vm104_vm0, %v51_v35 }
  0x93   :  { %669 = vmatprep.mubr.msk.f32.mxu0 %vm104_vm0, %v52_v36 }
  0x94   :  { %v92_v54 = vpop.permute.xlu1 %91 }
  0x95   :  { %v261_v22 = vpop.permute.xlu0 %260 }
  0x96   :  { %670 = vmatmul.mubr.msk.f32.gmra.mrb[4].mxu0 %vm104_vm0, %v53_v37 }
  0x97   :  { %672 = vmatprep.mubr.msk.f32.mxu0 %vm104_vm0, %v54_v38 }
  0x98   :  { %v102_v2 = vpop.permute.xlu1 %101 }
  0x99   :  { %v271_v25 = vpop.permute.xlu0 %270 }
  0x9a   :  { %673 = vmatmul.mubr.msk.f32.gmra.mrb[6].mxu0 %vm104_vm0, %v55_v39 }
  0x9b   :  { %719 = vmatprep.mubr.msk.f32.mxu0 %vm298_vm1, %v436_v20 }
  0x9c   :  { %v266_v21 = vpop.permute.xlu1 %265 }
  0xa0   :  { %v276_v23 = vpop.permute.xlu1 %275 }
  0xa4   :  { %v286_v38 = vpop.permute.xlu1 %285 }
 0x161   :  { %v665_v44 = vpop.f32.mrb[0].mxu0 }
 0x162   :  { %v201_v46 = vadd.f32 %v665_v44, %v72_v42  ;;  %v195_v47 = vpop.f32.mrb[1].mxu0 }
 0x163   :  { %v196_v48 = vadd.f32 %v195_v47, %v67_v41  ;;  %v281_v41 = vpop.permute.xlu0 %280 }
 0x164   :  { %v235_v49 = vmax.f32 %v201_v46, 0.0 }
 0x165   :  { %v234_v50 = vmax.f32 %v196_v48, 0.0  ;;  %v668_v51 = vpop.f32.mrb[2].mxu0 }
 0x166   :  { %v211_v52 = vadd.f32 %v668_v51, %v82_v43  ;;  %v205_v53 = vpop.f32.mrb[3].mxu0 }
 0x167   :  { %v206_v55 = vadd.f32 %v205_v53, %v77_v45  ;;  %v729_v56 = vpack.c.bf16 %v235_v49, %v234_v50  ;;  %v296_v50 = vpop.permute.xlu1 %295  ;;  %v291_v53 = vpop.permute.xlu0 %290 }
 0x168   :  { %v237_v58 = vmax.f32 %v211_v52, 0.0 }
 0x169   :  { %v236_v59 = vmax.f32 %v206_v55, 0.0  ;;  %v671_v60 = vpop.f32.mrb[4].mxu0  ;;  %730 = vmatprep.subr.bf16.mxu1 %v729_v56 }
 0x16a   :  { %v221_v61 = vadd.f32 %v671_v60, %v92_v54  ;;  %v215_v62 = vpop.f32.mrb[5].mxu0  ;;  %732 = vmatpush3.bf16.msra.mxu1 %v729_v56 }
 0x16b   :  { %v733_v63 = vpack.c.bf16 %v237_v58, %v236_v59  ;;  %v216_v0 = vadd.f32 %v215_v62, %v87_v57  ;;  %v438_v62 = vld [vmem:[%s1030_s6 + $0x10] sm:$0xff] }
 0x16c   :  { %v239_v1 = vmax.f32 %v221_v61, 0.0  ;;  %v437_v61 = vld [vmem:[%s1030_s6 + $0x8] sm:$0xff] }
 0x16d   :  { %v238_v3 = vmax.f32 %v216_v0, 0.0  ;;  %v674_v4 = vpop.f32.mrb[6].mxu0  ;;  %734 = vmatprep.subr.bf16.mxu1 %v733_v63  ;;  %v452_v0 = vpop.permute.xlu1 %451 }
 0x16e   :  { %v231_v6 = vadd.f32 %v674_v4, %v102_v2  ;;  %v225_v7 = vpop.f32.mrb[7].mxu0  ;;  %736 = vmatpush3.bf16.msra.mxu1 %v733_v63  ;;  %v439_v63 = vld [vmem:[%s1030_s6 + $0x18] sm:$0xff]  ;;  %v447_v2 = vpop.permute.xlu0 %446  ;;  %s796_s6 = smov [#allocation2]  }
 0x16f   :  { %v737_v8 = vpack.c.bf16 %v239_v1, %v238_v3  ;;  %v226_v9 = vadd.f32 %v225_v7, %v97_v5  ;;  %s590_s14 = sshll.u32 %s796_s6, 4  ;;  %s591_s14 = int_to_ptr.vmem [resolvable:$true] %s590_s14 }
 0x170   :  { %v241_v10 = vmax.f32 %v231_v6, 0.0  ;;  %s771_s1 = scalar_lea.vmem %s591_s14, 256  ;;  %p776_p1 = scmp.lt.s32.totalorder %s591_s14, %s591_s14 }
 0x171   :  { %v240_v11 = vmax.f32 %v226_v9, 0.0  ;;  %738 = vmatprep.subr.bf16.mxu1 %v737_v8  ;;  %p772_p0 = scmp.ne.s32.totalorder %s591_s14, %s771_s1  ;;  %p777_p2 = scmp.lt.s32.totalorder %s771_s1, %s771_s1 }
 0x172   :  { %740 = vmatpush3.bf16.msra.mxu1 %v737_v8 }
 0x173   :  { %v741_v12 = vpack.c.bf16 %v241_v10, %v240_v11  ;;  %v462_v10 = vpop.permute.xlu1 %461  ;;  %v457_v11 = vpop.permute.xlu0 %456  ;;  %p778_p3 = por %p777_p2, %p776_p1 }
 0x175   :  { %742 = vmatprep.subr.bf16.mxu1 %v741_v12  ;;  %p779_p4 = pnand %p778_p3, %p772_p0 }
 0x176   :  { %744 = vmatpush3.bf16.msra.mxu1 %v741_v12 }
 0x179   :  { %692 = vmatmul.mubr.msk.f32.vlgmr.msra.gmra.mrb[0].mxu1 %vm298_vm1, %v243_v13 }
 0x17a   :  { %694 = vmatprep.mubr.msk.f32.mxu1 %vm298_vm1, %v244_v14 }
 0x17d   :  { %695 = vmatmul.mubr.msk.f32.gmra.mrb[2].mxu1 %vm298_vm1, %v245_v15 }
 0x17e   :  { %697 = vmatprep.mubr.msk.f32.mxu1 %vm298_vm1, %v246_v16 }
 0x181   :  { %698 = vmatmul.mubr.msk.f32.gmra.mrb[4].mxu1 %vm298_vm1, %v247_v17 }
 0x182   :  { %700 = vmatprep.mubr.msk.f32.mxu1 %vm298_vm1, %v248_v18 }
 0x185   :  { %701 = vmatmul.mubr.msk.f32.gmra.mrb[6].mxu1 %vm298_vm1, %v249_v19  ;;  %v577_v19 = vpop.permute.xlu1 %576 }
 0x24c   :  { %v693_v24 = vpop.f32.mrb[0].mxu1 }
 0x24d   :  { %v395_v26 = vadd.f32 %v693_v24, %v266_v21  ;;  %v389_v29 = vpop.f32.mrb[1].mxu1  ;;  %v572_v21 = vpop.permute.xlu0 %571 }
 0x24e   :  { %v390_v32 = vadd.f32 %v389_v29, %v261_v22 }
 0x24f   :  { %v429_v33 = vmax.f32 %v395_v26, 0.0 }
 0x250   :  { %v428_v34 = vmax.f32 %v390_v32, 0.0  ;;  %v696_v35 = vpop.f32.mrb[2].mxu1 }
 0x251   :  { %v405_v36 = vadd.f32 %v696_v35, %v276_v23  ;;  %v399_v37 = vpop.f32.mrb[3].mxu1 }
 0x252   :  { %v745_v39 = vpack.c.bf16 %v429_v33, %v428_v34  ;;  %v400_v40 = vadd.f32 %v399_v37, %v271_v25 }
 0x253   :  { %v431_v42 = vmax.f32 %v405_v36, 0.0 }
 0x254   :  { %v430_v43 = vmax.f32 %v400_v40, 0.0  ;;  %v699_v44 = vpop.f32.mrb[4].mxu1  ;;  %746 = vmatprep.subr.bf16.mxu0 %v745_v39 }
 0x255   :  { %v415_v45 = vadd.f32 %v699_v44, %v286_v38  ;;  %v409_v46 = vpop.f32.mrb[5].mxu1  ;;  %748 = vmatpush3.bf16.msra.mxu0 %v745_v39 }
 0x256   :  { %v749_v47 = vpack.c.bf16 %v431_v42, %v430_v43  ;;  %v410_v48 = vadd.f32 %v409_v46, %v281_v41 }
 0x257   :  { %v433_v49 = vmax.f32 %v415_v45, 0.0 }
 0x258   :  { %v432_v51 = vmax.f32 %v410_v48, 0.0  ;;  %v702_v52 = vpop.f32.mrb[6].mxu1  ;;  %750 = vmatprep.subr.bf16.mxu0 %v749_v47 }
 0x259   :  { %v425_v54 = vadd.f32 %v702_v52, %v296_v50  ;;  %v419_v55 = vpop.f32.mrb[7].mxu1  ;;  %752 = vmatpush3.bf16.msra.mxu0 %v749_v47 }
 0x25a   :  { %v753_v56 = vpack.c.bf16 %v433_v49, %v432_v51  ;;  %v420_v57 = vadd.f32 %v419_v55, %v291_v53 }
 0x25b   :  { %v435_v58 = vmax.f32 %v425_v54, 0.0 }
 0x25c   :  { %v434_v59 = vmax.f32 %v420_v57, 0.0  ;;  %754 = vmatprep.subr.bf16.mxu0 %v753_v56 }
 0x25d   :  { %756 = vmatpush3.bf16.msra.mxu0 %v753_v56 }
 0x25e   :  { %v757_v60 = vpack.c.bf16 %v435_v58, %v434_v59 }
 0x260   :  { %758 = vmatprep.subr.bf16.mxu0 %v757_v60 }
 0x261   :  { %760 = vmatpush3.bf16.msra.mxu0 %v757_v60 }
 0x264   :  { %720 = vmatmul.mubr.msk.f32.vlgmr.msra.gmra.mrb[8].mxu0 %vm298_vm1, %v437_v61 }
 0x265   :  { %722 = vmatprep.mubr.msk.f32.mxu0 %vm298_vm1, %v438_v62 }
 0x268   :  { %723 = vmatmul.mubr.msk.f32.gmra.mrb[10].mxu0 %vm298_vm1, %v439_v63 }
 0x337   :  { %v721_v1 = vpop.f32.mrb[8].mxu0 }
 0x338   :  { %v548_v3 = vadd.f32 %v721_v1, %v452_v0  ;;  %v542_v4 = vpop.f32.mrb[9].mxu0 }
 0x339   :  { %v543_v5 = vadd.f32 %v542_v4, %v447_v2 }
 0x33a   :  { %v563_v6 = vmul.f32 1.442695, %v548_v3 }
 0x33b   :  { %v561_v7 = vmul.f32 1.442695, %v543_v5  ;;  %v724_v8 = vpop.f32.mrb[10].mxu0 }
 0x33c   :  { %767 = vpow2.f32 %v563_v6  ;;  %v552_v9 = vpop.f32.mrb[11].mxu0  ;;  %v558_v14 = vadd.f32 %v724_v8, %v462_v10 }
 0x33d   :  { %769 = vpow2.f32 %v561_v7  ;;  %v553_v16 = vadd.f32 %v552_v9, %v457_v11 }
 0x346   :  { %v768_v12 = vpop.eup %767 }
 0x347   :  { %v770_v13 = vpop.eup %769  ;;  %v566_v15 = vmul.f32 %v768_v12, %v922_v28 }
 0x348   :  { %v565_v17 = vmul.f32 %v770_v13, %v917_v27 }
 0x349   :  { %v568_v18 = vadd.f32 %v566_v15, %v558_v14 }
 0x34a   :  { %v567_v20 = vadd.f32 %v565_v17, %v553_v16 }
 0x34b   :  { %v580_v22 = vmul.f32 %v577_v19, %v568_v18 }
 0x34c   :  { %v579_v23 = vmul.f32 %v572_v21, %v567_v20 }
 0x34d   :  { %v582_v24 = vadd.f32 %v580_v22, %v928_v31 }
 0x34e   :  { %v581_v25 = vadd.f32 %v579_v23, %v925_v30 }
 0x34f   :  { %584 = vst [vmem:[#allocation2 + $0x8] sm:$0xff] %v582_v24 }
 0x350   :  { %583 = vst [vmem:[#allocation2] sm:$0xff] %v581_v25 }
 0x351   :  { %782 = shalt.err (!%p779_p4)
}
 0x352   :  { %s783_s17 = scalar_lea.hbm %s1032_s8, 256 }
 0x353   :  { %p784_p5 = scmp.ne.s32.totalorder %s1032_s8, %s783_s17  ;;  %p787_p6 = scmp.lt.u32.totalorder %s783_s17, %s1032_s8 }
 0x355   :  { %p789_p7 = pnand %p787_p6, %p784_p5 }
 0x357   :  { %792 = shalt.err (!%p789_p7)
}
 0x358   :  { %s797_s21 = smov 128   ;;  %s798_s22 = smov 8  }
 0x359   :  { %596 = dma.vmem_to_hbm [thread:$0]  %s591_s14, 256, %s1032_s8, [#allocation3], %s797_s21, %s797_s21, %s798_s22  }
 0x35a   :  { %793 = dma.done.wait [#allocation3], 256  }
 0x35b   :  { %794 = vsyncadd [#allocation3], 4294967040 }
 0x35c   :  { %600 = vsyncpa [#allocation3], 1 }

</bundles_post_ra>
